<compile_context>
chip_gen: v7x
topology: tpu7x:2x2x1
jax: 0.10.0
libtpu: 0.0.40
codegen_flags: <defaults>
</compile_context>

<pallas_src>
import functools

import jax
import jax.numpy as jnp
from jax.experimental import pallas as pl
from jax.experimental.pallas import tpu as pltpu


# --------------------------------------------------------------------------
# Kernel
# --------------------------------------------------------------------------
def edge_feat_kernel(n_ref, s_ref, v_ref, wt_ref, b_ref, o_ref, *, chunk):
    # n_ref  : (Npad, C)      full n, resident in VMEM across the grid
    # s_ref  : (TI, Npad, C)  s[i-block]
    # v_ref  : (TI, Npad, C)  v[i-block]
    # wt_ref : (C, C)         W.T (resident), f32 or bf16
    # b_ref  : (1, C)         Linear bias (resident), f32
    # o_ref  : (TI, Npad, C)
    ti, npad, c = s_ref.shape
    i = pl.program_id(0)
    row0 = i * ti                       # first global row of this i-block

    def body(ci, carry):
        off = pl.multiple_of(ci * chunk, 8)                 # offset inside block
        gstart = pl.multiple_of(row0 + ci * chunk, 8)       # global n-row start

        ni = n_ref[pl.ds(gstart, chunk), :]                 # (chunk, C)
        sc = s_ref[pl.ds(off, chunk), :, :]                 # (chunk, Npad, C)

        # Elementwise triple product in f32 on the VPU.
        e = ni[:, None, :] * n_ref[...][None, :, :] * sc    # (chunk, Npad, C)

        # Linear: one (chunk*Npad, C) x (C, C) MXU matmul, f32 accumulation.
        # Cast (no-op when wt is f32) is fused before the reshape.
        y = jnp.dot(
            e.astype(wt_ref.dtype).reshape(chunk * npad, c),
            wt_ref[...],
            preferred_element_type=jnp.float32,
        )
        y = (y + b_ref[...]).reshape(chunk, npad, c)

        # Final v-scaling + store of this chunk.
        o_ref[pl.ds(off, chunk), :, :] = (
            y * v_ref[pl.ds(off, chunk), :, :]
        ).astype(o_ref.dtype)
        return carry

    n_chunks = ti // chunk
    jax.lax.fori_loop(0, n_chunks, body, 0, unroll=min(8, n_chunks))


# --------------------------------------------------------------------------
# VMEM / tiling heuristics
# --------------------------------------------------------------------------
def _vmem_capacity_bytes():
    """Per-TensorCore VMEM capacity; conservative 64 MiB (v7x) fallback."""
    cap = None
    get_info = getattr(pltpu, "get_tpu_info", None)
    if get_info is not None:
        try:
            cap = int(getattr(get_info(), "vmem_capacity_bytes", 0)) or None
        except Exception:
            cap = None
    if cap is None:
        cap = 64 * 1024 * 1024
    try:
        kind = jax.devices()[0].device_kind.lower()
        if "v7" in kind:                       # 64 MiB per TC on v7x
            cap = min(cap, 64 * 1024 * 1024)
    except Exception:
        pass
    return cap


def _num_tensorcores():
    """TensorCores a 'parallel' grid axis can shard across (heuristic)."""
    try:
        kind = jax.devices()[0].device_kind.lower()
    except Exception:
        return 1
    return 2 if any(t in kind for t in ("v4", "v5p", "v7")) else 1


def _choose_ti(npad, c, budget_bytes, cores, chunk, mm_itemsize):
    """Largest i-tile (multiple of `chunk`, divisor of npad) whose
    double-buffered s/v/out streams + residents + intermediates fit the
    budget; on multi-TC parts prefer a balanced grid with >= 2 steps/core."""
    f32 = 4
    stream_row = 3 * 2 * npad * c * f32                     # s, v, out (x2 buffers)
    resident = 2 * (npad * c * f32) + 2 * (c * c * mm_itemsize) + 2 * (8 * c * f32)
    interm = 4 * chunk * npad * c * f32                     # e, cast copy, y, slack
    avail = budget_bytes - resident - interm
    max_ti = (avail // stream_row) if avail > 0 else 0

    cands = [d for d in range(chunk, npad + 1, chunk) if npad % d == 0]
    fitting = [d for d in cands if d <= max_ti]
    if not fitting:
        return cands[0]                                     # minimum viable tile
    if cores > 1:
        for min_steps in (2 * cores, cores):
            pref = [d for d in fitting
                    if (npad // d) % cores == 0 and (npad // d) >= min_steps]
            if pref:
                return max(pref)
    return max(fitting)


# --------------------------------------------------------------------------
# Wrapper
# --------------------------------------------------------------------------
@jax.jit
def edge_feat(n, s, v, w, b):
    """n: (N, C), s: (N, N, C), v: (N, N, C),
    w: (C, C) PyTorch Linear weight (out_features, in_features), b: (C,).
    Returns (N, N, C)."""
    N, C = n.shape
    npad = ((N + 7) // 8) * 8
    if npad != N:
        p = npad - N
        n_p = jnp.pad(n, ((0, p), (0, 0)))
        s_p = jnp.pad(s, ((0, p), (0, p), (0, 0)))
        v_p = jnp.pad(v, ((0, p), (0, p), (0, 0)))
    else:
        n_p, s_p, v_p = n, s, v

    # f32 Linear when it stays hidden under HBM (C <= 128); bf16 for larger C.
    mm_dtype = jnp.float32 if C <= 128 else jnp.bfloat16
    chunk = 8

    cap = _vmem_capacity_bytes()
    vmem_limit = min(int(cap * 0.9), 110 * 1024 * 1024)
    budget = int(vmem_limit * 0.8)                # headroom for compiler scratch
    cores = _num_tensorcores()
    ti = _choose_ti(npad, C, budget, cores, chunk, jnp.dtype(mm_dtype).itemsize)

    wt = w.T.astype(mm_dtype)                     # y = e @ W.T + b
    b2 = b.reshape(1, C).astype(jnp.float32)

    out_p = pl.pallas_call(
        functools.partial(edge_feat_kernel, chunk=chunk),
        out_shape=jax.ShapeDtypeStruct((npad, npad, C), n.dtype),
        grid_spec=pltpu.PrefetchScalarGridSpec(
            num_scalar_prefetch=0,
            grid=(npad // ti,),
            in_specs=[
                pl.BlockSpec((npad, C), lambda i: (0, 0)),         # n (resident)
                pl.BlockSpec((ti, npad, C), lambda i: (i, 0, 0)),  # s block
                pl.BlockSpec((ti, npad, C), lambda i: (i, 0, 0)),  # v block
                pl.BlockSpec((C, C), lambda i: (0, 0)),            # W.T (resident)
                pl.BlockSpec((1, C), lambda i: (0, 0)),            # bias (resident)
            ],
            out_specs=pl.BlockSpec((ti, npad, C), lambda i: (i, 0, 0)),
        ),
        compiler_params=pltpu.CompilerParams(
            dimension_semantics=("parallel",),
            vmem_limit_bytes=vmem_limit,
        ),
    )(n_p, s_p, v_p, wt, b2)

    if npad != N:
        out_p = out_p[:N, :N, :]
    return out_p


# --------------------------------------------------------------------------
# Pure-JAX reference + self-test
# --------------------------------------------------------------------------
def edge_feat_ref(n, s, v, w, b):
    e = jnp.einsum('nc,mc,nmc->nmc', n, n, s)
    N, C = n.shape
    y = jnp.dot(e.reshape(N * N, C), w.T, precision='highest') + b
    return y.reshape(N, N, C) * v


if __name__ == "__main__":
    N, C = 16, 128          # atoms, feature dim (small example; dim=C)
    key = jax.random.PRNGKey(0)
    k1, k2, k3, k4, k5 = jax.random.split(key, 5)

    n = jax.random.normal(k1, (N, C), dtype=jnp.float32)
    s = jax.random.normal(k2, (N, N, C), dtype=jnp.float32)
    v = jax.random.normal(k3, (N, N, C), dtype=jnp.float32)

    # Deterministic nn.Linear(dim, dim) params (PyTorch weight layout: (out, in))
    bound = 1.0 / (C ** 0.5)
    w = jax.random.uniform(k4, (C, C), dtype=jnp.float32, minval=-bound, maxval=bound)
    b = jax.random.uniform(k5, (C,), dtype=jnp.float32, minval=-bound, maxval=bound)

    out = jax.block_until_ready(edge_feat(n, s, v, w, b))
    ref = edge_feat_ref(n, s, v, w, b)

    assert out.shape == (N, N, C)
    # f32 MXU path at C=128 -> tight agreement with the f32 reference.
    assert jnp.allclose(out, ref, atol=1e-2, rtol=1e-2)
    print("KERNEL_OK")
</pallas_src>

<mosaic_0001>
module attributes {stable_mosaic.version = 11 : i64} {
  func.func @edge_feat_kernel(%arg0: i32, %arg1: memref<16x128xf32, #tpu.memory_space<vmem>>, %arg2: memref<16x16x128xf32, #tpu.memory_space<vmem>>, %arg3: memref<16x16x128xf32, #tpu.memory_space<vmem>>, %arg4: memref<128x128xf32, #tpu.memory_space<vmem>>, %arg5: memref<1x128xf32, #tpu.memory_space<vmem>>, %arg6: memref<16x16x128xf32, #tpu.memory_space<vmem>>) attributes {dimension_semantics = [#tpu.dimension_semantics<parallel>], iteration_bounds = array<i64: 1>, scalar_prefetch = 0 : i64, scratch_operands = 0 : i64, tpu.core_type = #tpu.core_type<tc>, window_params = [{pipeline_mode = #tpu.pipeline_mode<synchronous>, transform_indices = @transform_0, window_bounds = array<i64: 16, 128>}, {transform_indices = @transform_1, window_bounds = array<i64: 16, 16, 128>}, {transform_indices = @transform_2, window_bounds = array<i64: 16, 16, 128>}, {pipeline_mode = #tpu.pipeline_mode<synchronous>, transform_indices = @transform_3, window_bounds = array<i64: 128, 128>}, {pipeline_mode = #tpu.pipeline_mode<synchronous>, transform_indices = @transform_4, window_bounds = array<i64: 1, 128>}, {transform_indices = @transform_5, window_bounds = array<i64: 16, 16, 128>}]} {
    %c16_i32 = arith.constant 16 : i32
    %0 = arith.muli %arg0, %c16_i32 : i32
    %c0_i32 = arith.constant 0 : i32
    %c8_i32 = arith.constant 8 : i32
    %1 = arith.muli %c0_i32, %c8_i32 : i32
    %2 = tpu.assume_multiple %1, 8 : i32
    %c8_i32_0 = arith.constant 8 : i32
    %3 = arith.muli %c0_i32, %c8_i32_0 : i32
    %4 = arith.addi %0, %3 : i32
    %5 = tpu.assume_multiple %4, 8 : i32
    %6 = arith.index_cast %5 : i32 to index
    %c0 = arith.constant 0 : index
    %7 = vector.load %arg1[%6, %c0] : memref<16x128xf32, #tpu.memory_space<vmem>>, vector<8x128xf32>
    %8 = arith.index_cast %2 : i32 to index
    %c0_1 = arith.constant 0 : index
    %c0_2 = arith.constant 0 : index
    %9 = vector.load %arg2[%8, %c0_1, %c0_2] : memref<16x16x128xf32, #tpu.memory_space<vmem>>, vector<8x16x128xf32>
    %10 = vector.shape_cast %7 : vector<8x128xf32> to vector<8x1x128xf32>
    %c0_3 = arith.constant 0 : index
    %c0_4 = arith.constant 0 : index
    %11 = vector.load %arg1[%c0_3, %c0_4] : memref<16x128xf32, #tpu.memory_space<vmem>>, vector<16x128xf32>
    %12 = vector.shape_cast %11 : vector<16x128xf32> to vector<1x16x128xf32>
    %13 = vector.broadcast %10 : vector<8x1x128xf32> to vector<8x16x128xf32>
    %14 = vector.broadcast %12 : vector<1x16x128xf32> to vector<8x16x128xf32>
    %15 = arith.mulf %13, %14 : vector<8x16x128xf32>
    %16 = arith.mulf %15, %9 : vector<8x16x128xf32>
    %17 = vector.shape_cast %16 : vector<8x16x128xf32> to vector<128x128xf32>
    %c0_5 = arith.constant 0 : index
    %c0_6 = arith.constant 0 : index
    %18 = vector.load %arg4[%c0_5, %c0_6] : memref<128x128xf32, #tpu.memory_space<vmem>>, vector<128x128xf32>
    %cst = arith.constant dense<0.000000e+00> : vector<128x128xf32>
    %19 = tpu.matmul %17, %18, %cst {dimension_numbers = #tpu.dot_dimension_numbers<[1], [0], [0], [1], [0, 0, 1, 1], [], []>} : vector<128x128xf32>, vector<128x128xf32>, vector<128x128xf32> -> vector<128x128xf32>
    %c0_7 = arith.constant 0 : index
    %c0_8 = arith.constant 0 : index
    %20 = vector.load %arg5[%c0_7, %c0_8] : memref<1x128xf32, #tpu.memory_space<vmem>>, vector<1x128xf32>
    %21 = vector.broadcast %20 : vector<1x128xf32> to vector<128x128xf32>
    %22 = arith.addf %19, %21 : vector<128x128xf32>
    %23 = vector.shape_cast %22 : vector<128x128xf32> to vector<8x16x128xf32>
    %24 = arith.index_cast %2 : i32 to index
    %c0_9 = arith.constant 0 : index
    %c0_10 = arith.constant 0 : index
    %25 = vector.load %arg3[%24, %c0_9, %c0_10] : memref<16x16x128xf32, #tpu.memory_space<vmem>>, vector<8x16x128xf32>
    %26 = arith.mulf %23, %25 : vector<8x16x128xf32>
    %27 = arith.index_cast %2 : i32 to index
    %c0_11 = arith.constant 0 : index
    %c0_12 = arith.constant 0 : index
    %28 = vector.load %arg6[%27, %c0_11, %c0_12] : memref<16x16x128xf32, #tpu.memory_space<vmem>>, vector<8x16x128xf32>
    tpu.vector_store %arg6[%27, %c0_11, %c0_12], %26 {strides = array<i32>} : memref<16x16x128xf32, #tpu.memory_space<vmem>>, vector<8x16x128xf32>,
    %c1_i32 = arith.constant 1 : i32
    %c8_i32_13 = arith.constant 8 : i32
    %29 = arith.muli %c1_i32, %c8_i32_13 : i32
    %30 = tpu.assume_multiple %29, 8 : i32
    %c8_i32_14 = arith.constant 8 : i32
    %31 = arith.muli %c1_i32, %c8_i32_14 : i32
    %32 = arith.addi %0, %31 : i32
    %33 = tpu.assume_multiple %32, 8 : i32
    %34 = arith.index_cast %33 : i32 to index
    %c0_15 = arith.constant 0 : index
    %35 = vector.load %arg1[%34, %c0_15] : memref<16x128xf32, #tpu.memory_space<vmem>>, vector<8x128xf32>
    %36 = arith.index_cast %30 : i32 to index
    %c0_16 = arith.constant 0 : index
    %c0_17 = arith.constant 0 : index
    %37 = vector.load %arg2[%36, %c0_16, %c0_17] : memref<16x16x128xf32, #tpu.memory_space<vmem>>, vector<8x16x128xf32>
    %38 = vector.shape_cast %35 : vector<8x128xf32> to vector<8x1x128xf32>
    %c0_18 = arith.constant 0 : index
    %c0_19 = arith.constant 0 : index
    %39 = vector.load %arg1[%c0_18, %c0_19] : memref<16x128xf32, #tpu.memory_space<vmem>>, vector<16x128xf32>
    %40 = vector.shape_cast %39 : vector<16x128xf32> to vector<1x16x128xf32>
    %41 = vector.broadcast %38 : vector<8x1x128xf32> to vector<8x16x128xf32>
    %42 = vector.broadcast %40 : vector<1x16x128xf32> to vector<8x16x128xf32>
    %43 = arith.mulf %41, %42 : vector<8x16x128xf32>
    %44 = arith.mulf %43, %37 : vector<8x16x128xf32>
    %45 = vector.shape_cast %44 : vector<8x16x128xf32> to vector<128x128xf32>
    %c0_20 = arith.constant 0 : index
    %c0_21 = arith.constant 0 : index
    %46 = vector.load %arg4[%c0_20, %c0_21] : memref<128x128xf32, #tpu.memory_space<vmem>>, vector<128x128xf32>
    %cst_22 = arith.constant dense<0.000000e+00> : vector<128x128xf32>
    %47 = tpu.matmul %45, %46, %cst_22 {dimension_numbers = #tpu.dot_dimension_numbers<[1], [0], [0], [1], [0, 0, 1, 1], [], []>} : vector<128x128xf32>, vector<128x128xf32>, vector<128x128xf32> -> vector<128x128xf32>
    %c0_23 = arith.constant 0 : index
    %c0_24 = arith.constant 0 : index
    %48 = vector.load %arg5[%c0_23, %c0_24] : memref<1x128xf32, #tpu.memory_space<vmem>>, vector<1x128xf32>
    %49 = vector.broadcast %48 : vector<1x128xf32> to vector<128x128xf32>
    %50 = arith.addf %47, %49 : vector<128x128xf32>
    %51 = vector.shape_cast %50 : vector<128x128xf32> to vector<8x16x128xf32>
    %52 = arith.index_cast %30 : i32 to index
    %c0_25 = arith.constant 0 : index
    %c0_26 = arith.constant 0 : index
    %53 = vector.load %arg3[%52, %c0_25, %c0_26] : memref<16x16x128xf32, #tpu.memory_space<vmem>>, vector<8x16x128xf32>
    %54 = arith.mulf %51, %53 : vector<8x16x128xf32>
    %55 = arith.index_cast %30 : i32 to index
    %c0_27 = arith.constant 0 : index
    %c0_28 = arith.constant 0 : index
    %56 = vector.load %arg6[%55, %c0_27, %c0_28] : memref<16x16x128xf32, #tpu.memory_space<vmem>>, vector<8x16x128xf32>
    tpu.vector_store %arg6[%55, %c0_27, %c0_28], %54 {strides = array<i32>} : memref<16x16x128xf32, #tpu.memory_space<vmem>>, vector<8x16x128xf32>,
    %c2_i32 = arith.constant 2 : i32
    return
  }
  func.func @transform_0(%arg0: i32) -> (i32, i32) {
    %c0_i32 = arith.constant 0 : i32
    %c0_i32_0 = arith.constant 0 : i32
    %c0_i32_1 = arith.constant 0 : i32
    return %c0_i32, %c0_i32_0 : i32, i32
  }
  func.func @transform_1(%arg0: i32) -> (i32, i32, i32) {
    %c0_i32 = arith.constant 0 : i32
    %c0_i32_0 = arith.constant 0 : i32
    %c0_i32_1 = arith.constant 0 : i32
    return %arg0, %c0_i32, %c0_i32_0 : i32, i32, i32
  }
  func.func @transform_2(%arg0: i32) -> (i32, i32, i32) {
    %c0_i32 = arith.constant 0 : i32
    %c0_i32_0 = arith.constant 0 : i32
    %c0_i32_1 = arith.constant 0 : i32
    return %arg0, %c0_i32, %c0_i32_0 : i32, i32, i32
  }
  func.func @transform_3(%arg0: i32) -> (i32, i32) {
    %c0_i32 = arith.constant 0 : i32
    %c0_i32_0 = arith.constant 0 : i32
    %c0_i32_1 = arith.constant 0 : i32
    return %c0_i32, %c0_i32_0 : i32, i32
  }
  func.func @transform_4(%arg0: i32) -> (i32, i32) {
    %c0_i32 = arith.constant 0 : i32
    %c0_i32_0 = arith.constant 0 : i32
    %c0_i32_1 = arith.constant 0 : i32
    return %c0_i32, %c0_i32_0 : i32, i32
  }
  func.func @transform_5(%arg0: i32) -> (i32, i32, i32) {
    %c0_i32 = arith.constant 0 : i32
    %c0_i32_0 = arith.constant 0 : i32
    %c0_i32_1 = arith.constant 0 : i32
    return %arg0, %c0_i32, %c0_i32_0 : i32, i32, i32
  }
}

</mosaic_0001>

<bundles_post_ra>
// kernel: edge_feat.1
= control target key start
LH: loop header
LB: loop body
LE: loop exit
PB: predicated region body
PF: predicated region fallthrough
CT: control target
= control target key end

     0   :  { %10 = vsyncpa [#allocation3], 0  ;;  %s1486_s0 = inlined_call_operand.hbm [shape: f32[16,128], index: 0, kind: input, shape index: {}]   ;;  %s1487_s1 = inlined_call_operand.vmem [shape: f32[16,16,128], index: 1, kind: input, shape index: {}]   ;;  %s1488_s2 = inlined_call_operand.hbm [shape: f32[16,16,128], index: 2, kind: input, shape index: {}]   ;;  %s1489_s3 = inlined_call_operand.vmem [shape: f32[128,128], index: 3, kind: input, shape index: {}]   ;;  %s1490_s4 = inlined_call_operand.vmem [shape: f32[1,128], index: 4, kind: input, shape index: {}]   ;;  %s1491_s5 = inlined_call_operand.hbm [shape: f32[16,16,128], index: 5, kind: output, shape index: {}]  }
   0x1   :  { %11 = vsyncpa [#allocation6], 0 }
   0x2   :  { %12 = vsyncpa [#allocation4], 0  ;;  %s1135_s18 = smov [#allocation2]   ;;  %s1063_s22 = scalar_lea.hbm %s1486_s0, 256 }
   0x3   :  { %s18_s19 = sshll.u32 %s1135_s18, 4  ;;  %p1064_p0 = scmp.ne.s32.totalorder %s1486_s0, %s1063_s22  ;;  %s19_s19 = int_to_ptr.vmem [resolvable:$true] %s18_s19 }
   0x4   :  { %p1067_p1 = scmp.lt.u32.totalorder %s1063_s22, %s1486_s0 }
   0x6   :  { %p1069_p2 = pnand %p1067_p1, %p1064_p0 }
   0x8   :  { %1072 = shalt.err (!%p1069_p2)
}
   0x9   :  { %s1073_s27 = scalar_lea.vmem %s19_s19, 256  ;;  %p1078_p4 = scmp.lt.s32.totalorder %s19_s19, %s19_s19 }
   0xa   :  { %p1074_p3 = scmp.ne.s32.totalorder %s19_s19, %s1073_s27  ;;  %p1079_p5 = scmp.lt.s32.totalorder %s1073_s27, %s1073_s27 }
   0xc   :  { %p1080_p6 = por %p1079_p5, %p1078_p4 }
   0xe   :  { %p1081_p7 = pnand %p1080_p6, %p1074_p3 }
  0x10   :  { %1084 = shalt.err (!%p1081_p7)
}
  0x11   :  { %s1136_s28 = smov 128   ;;  %s1137_s29 = smov 8  }
  0x12   :  { %24 = dma.hbm_to_vmem [thread:$0]  %s1486_s0, 256, %s19_s19, [#allocation3], %s1136_s28, %s1136_s28, %s1137_s29  }
  0x13   :  { %s1138_s7 = smov [#allocation5]   ;;  %s1085_s11 = scalar_lea.hbm %s1488_s2, 4096 }
  0x14   :  { %s32_s8 = sshll.u32 %s1138_s7, 4  ;;  %p1086_p8 = scmp.ne.s32.totalorder %s1488_s2, %s1085_s11  ;;  %s33_s8 = int_to_ptr.vmem [resolvable:$true] %s32_s8 }
  0x15   :  { %p1089_p9 = scmp.lt.u32.totalorder %s1085_s11, %s1488_s2 }
  0x17   :  { %p1091_p10 = pnand %p1089_p9, %p1086_p8 }
  0x19   :  { %1094 = shalt.err (!%p1091_p10)
}
  0x1a   :  { %s1095_s16 = scalar_lea.vmem %s33_s8, 4096  ;;  %p1100_p12 = scmp.lt.s32.totalorder %s33_s8, %s33_s8 }
  0x1b   :  { %p1096_p11 = scmp.ne.s32.totalorder %s33_s8, %s1095_s16  ;;  %p1101_p13 = scmp.lt.s32.totalorder %s1095_s16, %s1095_s16 }
  0x1d   :  { %p1102_p0 = por %p1101_p13, %p1100_p12 }
  0x1f   :  { %p1103_p1 = pnand %p1102_p0, %p1096_p11 }
  0x21   :  { %1106 = shalt.err (!%p1103_p1)
}
  0x22   :  { %38 = dma.hbm_to_vmem [thread:$0]  %s1488_s2, 4096, %s33_s8, [#allocation6], %s1136_s28, %s1136_s28, %s1137_s29  }
  0x23   :  { %1129 = dma.done.wait [#allocation3], 256  }
  0x24   :  { %1130 = vsyncadd [#allocation3], 4294967040 }
  0x25   :  { %1131 = dma.done.wait [#allocation6], 4096  }
  0x26   :  { %1132 = vsyncadd [#allocation6], 4294963200  ;;  %v1139_v0 = vmov 1966171168   ;;  %v75_v2 = vlaneseq  ;;  %v194_v5 = vld [vmem:[%s1489_s3] sm:$0xff]  ;;  %v195_v6 = vld [vmem:[%s1489_s3 + $0x8] sm:$0xff] }
  0x27   :  { %v73_v1 = vunpack.c.l.s4 %v1139_v0  ;;  %v196_v7 = vld [vmem:[%s1489_s3 + $0x10] sm:$0xff]  ;;  %v991_v8 = vpack.c.bf16 %v195_v6, %v194_v5  ;;  %v197_v9 = vld [vmem:[%s1489_s3 + $0x18] sm:$0xff]  ;;  %v198_v11 = vld [vmem:[%s1489_s3 + $0x20] sm:$0xff] }
  0x28   :  { %v76_v4 = vshrl.u32 %v75_v2, 7  ;;  %v995_v10 = vpack.c.bf16 %v197_v9, %v196_v7  ;;  %v199_v12 = vld [vmem:[%s1489_s3 + $0x28] sm:$0xff]  ;;  %v1221_v15 = vld [vmem:[#allocation2] sm:$0xff]  ;;  %v200_v16 = vld [vmem:[%s1489_s3 + $0x30] sm:$0xff] }
  0x29   :  { %v74_v3 = vunpack.c.0.s8 %v73_v1  ;;  %992 = vmatprep.subr.bf16.mxu0 %v991_v8  ;;  %1024 = vmatprep.subr.bf16.mxu1 %v991_v8  ;;  %v999_v14 = vpack.c.bf16 %v199_v12, %v198_v11  ;;  %v201_v17 = vld [vmem:[%s1489_s3 + $0x38] sm:$0xff]  ;;  %v1233_v20 = vld [vmem:[#allocation2 + $0x8] sm:$0xff]  ;;  %v202_v25 = vld [vmem:[%s1489_s3 + $0x40] sm:$0xff]  ;;  %v71_v46 = vcombine.high %v1221_v15, %v1221_v15 }
  0x2a   :  { %994 = vmatpush3.bf16.msra.mxu0 %v991_v8  ;;  %1026 = vmatpush3.bf16.msra.mxu1 %v991_v8  ;;  %v1231_v19 = vsub.s32 0, %v76_v4  ;;  %v1003_v23 = vpack.c.bf16 %v201_v17, %v200_v16  ;;  %v203_v26 = vld [vmem:[%s1489_s3 + $0x48] sm:$0xff]  ;;  %v54_v28 = vld [vmem:[%s1487_s1] sm:$0xff]  ;;  %v204_v34 = vld [vmem:[%s1489_s3 + $0x50] sm:$0xff]  ;;  %v434_v47 = vcombine.high %v1233_v20, %v1233_v20 }
  0x2b   :  { %v1219_v13 = vsub.s32 %v74_v3, %v76_v4  ;;  %996 = vmatprep.subr.bf16.mxu0 %v995_v10  ;;  %1028 = vmatprep.subr.bf16.mxu1 %v995_v10  ;;  %v798_v31 = vld [vmem:[%s1487_s1 + $0x80] sm:$0xff]  ;;  %v1007_v32 = vpack.c.bf16 %v203_v26, %v202_v25  ;;  %v205_v35 = vld [vmem:[%s1489_s3 + $0x58] sm:$0xff]  ;;  %v207_v42 = vld [vmem:[%s1489_s3 + $0x68] sm:$0xff] }
  0x2c   :  { %v1011_v40 = vpack.c.bf16 %v205_v35, %v204_v34  ;;  %v206_v41 = vld [vmem:[%s1489_s3 + $0x60] sm:$0xff]  ;;  %v208_v48 = vld [vmem:[%s1489_s3 + $0x70] sm:$0xff]  ;;  %v209_v49 = vld [vmem:[%s1489_s3 + $0x78] sm:$0xff] }
  0x2d   :  { %v78_v18 = vrot.slane %v1221_v15, %v1219_v13  ;;  %v441_v21 = vrot.slane %v1233_v20, %v1219_v13  ;;  %v1015_v45 = vpack.c.bf16 %v207_v42, %v206_v41  ;;  %v1019_v54 = vpack.c.bf16 %v209_v49, %v208_v48  ;;  %v55_v60 = vld [vmem:[%s1487_s1 + $0x8] sm:$0xff]  ;;  %v56_v1 = vld [vmem:[%s1487_s1 + $0x10] sm:$0xff]  ;;  %v801_v17 = vld [vmem:[%s1487_s1 + $0x98] sm:$0xff] }
  0x2e   :  { %998 = vmatpush3.bf16.msra.mxu0 %v995_v10  ;;  %1030 = vmatpush3.bf16.msra.mxu1 %v995_v10  ;;  %v85_v55 = vrot.slane %v71_v46, %v1219_v13  ;;  %v448_v56 = vrot.slane %v434_v47, %v1219_v13  ;;  %v799_v61 = vld [vmem:[%s1487_s1 + $0x88] sm:$0xff]  ;;  %v800_v2 = vld [vmem:[%s1487_s1 + $0x90] sm:$0xff]  ;;  %v57_v10 = vld [vmem:[%s1487_s1 + $0x18] sm:$0xff] }
  0x2f   :  { %v94_v22 = vrot.slane %v78_v18, %v1219_v13  ;;  %1000 = vmatprep.subr.bf16.mxu0 %v999_v14  ;;  %1032 = vmatprep.subr.bf16.mxu1 %v999_v14  ;;  %v457_v24 = vrot.slane %v441_v21, %v1219_v13  ;;  %v86_v37 = vcombine.high %v78_v18, %v78_v18  ;;  %v58_v18 = vld [vmem:[%s1487_s1 + $0x20] sm:$0xff]  ;;  %v803_v35 = vld [vmem:[%s1487_s1 + $0xa8] sm:$0xff]  ;;  %v60_v42 = vld [vmem:[%s1487_s1 + $0x30] sm:$0xff] }
  0x30   :  { %v449_v38 = vcombine.high %v441_v21, %v441_v21  ;;  %v1303_v6 = vrot.slane %v85_v55, %v1219_v13  ;;  %v1306_v7 = vrot.slane %v448_v56, %v1219_v13  ;;  %v450_v26 = vcombine.high %v448_v56, %v448_v56  ;;  %v61_v46 = vld [vmem:[%s1487_s1 + $0x38] sm:$0xff]  ;;  %v806_v56 = vld [vmem:[%s1487_s1 + $0xc0] sm:$0xff] }
  0x31   :  { %v125_v27 = vrot.slane %v94_v22, %v1231_v19  ;;  %v488_v29 = vrot.slane %v457_v24, %v1231_v19  ;;  %v108_v43 = vrot.slane %v86_v37, %v1219_v13  ;;  %v116_v50 = vcombine.high %v94_v22, %v94_v22  ;;  %v805_v49 = vld [vmem:[%s1487_s1 + $0xb8] sm:$0xff] }
  0x32   :  { %1002 = vmatpush3.bf16.msra.mxu0 %v999_v14  ;;  %1034 = vmatpush3.bf16.msra.mxu1 %v999_v14  ;;  %v471_v44 = vrot.slane %v449_v38, %v1219_v13  ;;  %v479_v51 = vcombine.high %v457_v24, %v457_v24  ;;  %v87_v22 = vcombine.high %v85_v55, %v85_v55 }
  0x33   :  { %v162_v30 = vmul.f32 %v125_v27, %v1221_v15  ;;  %1004 = vmatprep.subr.bf16.mxu0 %v1003_v23  ;;  %1036 = vmatprep.subr.bf16.mxu1 %v1003_v23  ;;  %v525_v33 = vmul.f32 %v488_v29, %v1221_v15  ;;  %v129_v52 = vrot.slane %v108_v43, %v1231_v19 }
  0x34   :  { %v492_v53 = vrot.slane %v471_v44, %v1231_v19  ;;  %v163_v57 = vmul.f32 %v1233_v20, %v125_v27  ;;  %v526_v58 = vmul.f32 %v488_v29, %v1233_v20  ;;  %v133_v59 = vrot.slane %v116_v50, %v1231_v19  ;;  %v62_v50 = vld [vmem:[%s1487_s1 + $0x40] sm:$0xff] }
  0x35   :  { %v178_v36 = vmul.f32 %v162_v30, %v54_v28  ;;  %v541_v39 = vmul.f32 %v798_v31, %v525_v33  ;;  %v164_v62 = vmul.f32 %v129_v52, %v1221_v15  ;;  %v496_v0 = vrot.slane %v479_v51, %v1231_v19  ;;  %v59_v31 = vld [vmem:[%s1487_s1 + $0x28] sm:$0xff] }
  0x36   :  { %1006 = vmatpush3.bf16.msra.mxu0 %v1003_v23  ;;  %1038 = vmatpush3.bf16.msra.mxu1 %v1003_v23  ;;  %v527_v63 = vmul.f32 %v492_v53, %v1221_v15  ;;  %v118_v3 = vcombine.high %v108_v43, %v108_v43  ;;  %v481_v4 = vcombine.high %v471_v44, %v471_v44  ;;  %v802_v23 = vld [vmem:[%s1487_s1 + $0xa0] sm:$0xff]  ;;  %v804_v43 = vld [vmem:[%s1487_s1 + $0xb0] sm:$0xff] }
  0x37   :  { %1008 = vmatprep.subr.bf16.mxu0 %v1007_v32  ;;  %1040 = vmatprep.subr.bf16.mxu1 %v1007_v32  ;;  %v165_v5 = vmul.f32 %v1233_v20, %v129_v52  ;;  %v179_v8 = vmul.f32 %v163_v57, %v55_v60  ;;  %v542_v9 = vmul.f32 %v799_v61, %v526_v58 }
  0x38   :  { %911 = vmatprep.mubr.f32.mxu0 %v178_v36  ;;  %967 = vmatprep.mubr.f32.mxu1 %v541_v39  ;;  %v528_v11 = vmul.f32 %v492_v53, %v1233_v20  ;;  %v166_v12 = vmul.f32 %v133_v59, %v1221_v15  ;;  %v180_v14 = vmul.f32 %v164_v62, %v56_v1  ;;  %v63_v1 = vld [vmem:[%s1487_s1 + $0x48] sm:$0xff] }
  0x39   :  { %v543_v16 = vmul.f32 %v800_v2, %v527_v63  ;;  %v529_v21 = vmul.f32 %v496_v0, %v1221_v15  ;;  %v137_v24 = vrot.slane %v118_v3, %v1231_v19  ;;  %v500_v25 = vrot.slane %v481_v4, %v1231_v19  ;;  %v807_v2 = vld [vmem:[%s1487_s1 + $0xc8] sm:$0xff] }
  0x3a   :  { %1010 = vmatpush3.bf16.msra.mxu0 %v1007_v32  ;;  %1042 = vmatpush3.bf16.msra.mxu1 %v1007_v32  ;;  %v181_v27 = vmul.f32 %v165_v5, %v57_v10  ;;  %v167_v28 = vmul.f32 %v1233_v20, %v133_v59  ;;  %v544_v29 = vmul.f32 %v801_v17, %v528_v11  ;;  %v64_v5 = vld [vmem:[%s1487_s1 + $0x50] sm:$0xff] }
  0x3b   :  { %1012 = vmatprep.subr.bf16.mxu0 %v1011_v40  ;;  %1044 = vmatprep.subr.bf16.mxu1 %v1011_v40  ;;  %v182_v30 = vmul.f32 %v166_v12, %v58_v18  ;;  %v530_v32 = vmul.f32 %v496_v0, %v1233_v20  ;;  %v141_v33 = vrot.slane %v1303_v6, %v1231_v19 }
  0x3c   :  { %v545_v34 = vmul.f32 %v802_v23, %v529_v21  ;;  %v504_v36 = vrot.slane %v1306_v7, %v1231_v19  ;;  %v1338_v37 = vrot.slane %v87_v22, %v1219_v13  ;;  %v168_v38 = vmul.f32 %v137_v24, %v1221_v15  ;;  %v65_v22 = vld [vmem:[%s1487_s1 + $0x58] sm:$0xff] }
  0x3d   :  { %v531_v39 = vmul.f32 %v500_v25, %v1221_v15  ;;  %v183_v41 = vmul.f32 %v167_v28, %v59_v31  ;;  %v169_v44 = vmul.f32 %v1233_v20, %v137_v24  ;;  %v532_v47 = vmul.f32 %v500_v25, %v1233_v20  ;;  %v809_v23 = vld [vmem:[%s1487_s1 + $0xd8] sm:$0xff]  ;;  %v66_v24 = vld [vmem:[%s1487_s1 + $0x60] sm:$0xff] }
  0x3e   :  { %1014 = vmatpush3.bf16.msra.mxu0 %v1011_v40  ;;  %1046 = vmatpush3.bf16.msra.mxu1 %v1011_v40  ;;  %v478_v40 = vrot.slane %v450_v26, %v1219_v13  ;;  %v170_v13 = vmul.f32 %v141_v33, %v1221_v15  ;;  %v117_v48 = vcombine.high %v1303_v6, %v1303_v6 }
  0x3f   :  { %1016 = vmatprep.subr.bf16.mxu0 %v1015_v45  ;;  %1048 = vmatprep.subr.bf16.mxu1 %v1015_v45  ;;  %v533_v51 = vmul.f32 %v504_v36, %v1221_v15  ;;  %v145_v52 = vrot.slane %v1338_v37, %v1231_v19  ;;  %v480_v53 = vcombine.high %v1306_v7, %v1306_v7 }
  0x40   :  { %v547_v55 = vmul.f32 %v804_v43, %v531_v39  ;;  %v508_v57 = vrot.slane %v478_v40, %v1231_v19  ;;  %v185_v58 = vmul.f32 %v169_v44, %v61_v46  ;;  %v171_v59 = vmul.f32 %v1233_v20, %v141_v33  ;;  %v67_v33 = vld [vmem:[%s1487_s1 + $0x68] sm:$0xff]  ;;  %v69_v44 = vld [vmem:[%s1487_s1 + $0x78] sm:$0xff] }
  0x41   :  { %v548_v60 = vmul.f32 %v805_v49, %v532_v47  ;;  %v186_v61 = vmul.f32 %v170_v13, %v62_v50  ;;  %v534_v62 = vmul.f32 %v504_v36, %v1233_v20  ;;  %v149_v63 = vrot.slane %v117_v48, %v1231_v19  ;;  %v364_v48 = vld [vmem:[#allocation5 + $0x8] sm:$0xff] }
  0x42   :  { %1018 = vmatpush3.bf16.msra.mxu0 %v1015_v45  ;;  %1050 = vmatpush3.bf16.msra.mxu1 %v1015_v45  ;;  %v546_v45 = vmul.f32 %v803_v35, %v530_v32  ;;  %v549_v0 = vmul.f32 %v806_v56, %v533_v51  ;;  %v172_v3 = vmul.f32 %v145_v52, %v1221_v15  ;;  %v727_v50 = vld [vmem:[#allocation5 + $0x88] sm:$0xff]  ;;  %v726_v56 = vld [vmem:[#allocation5 + $0x80] sm:$0xff] }
  0x43   :  { %1020 = vmatprep.subr.bf16.mxu0 %v1019_v54  ;;  %1052 = vmatprep.subr.bf16.mxu1 %v1019_v54  ;;  %v512_v4 = vrot.slane %v480_v53, %v1231_v19  ;;  %v535_v6 = vmul.f32 %v508_v57, %v1221_v15  ;;  %v119_v7 = vcombine.high %v1338_v37, %v1338_v37  ;;  %v68_v37 = vld [vmem:[%s1487_s1 + $0x70] sm:$0xff] }
  0x44   :  { %v187_v10 = vmul.f32 %v171_v59, %v63_v1  ;;  %v550_v11 = vmul.f32 %v807_v2, %v534_v62  ;;  %v173_v12 = vmul.f32 %v1233_v20, %v145_v52  ;;  %v536_v17 = vmul.f32 %v508_v57, %v1233_v20  ;;  %v729_v2 = vld [vmem:[#allocation5 + $0x98] sm:$0xff] }
  0x45   :  { %v537_v18 = vmul.f32 %v512_v4, %v1221_v15  ;;  %v153_v25 = vrot.slane %v119_v7, %v1231_v19  ;;  %v175_v28 = vmul.f32 %v1233_v20, %v149_v63 }
  0x46   :  { %1022 = vmatpush3.bf16.msra.mxu0 %v1019_v54  ;;  %1054 = vmatpush3.bf16.msra.mxu1 %v1019_v54  ;;  %v184_v54 = vmul.f32 %v168_v38, %v60_v42  ;;  %v552_v31 = vmul.f32 %v809_v23, %v536_v17  ;;  %v812_v38 = vld [vmem:[%s1487_s1 + $0xf0] sm:$0xff] }
  0x47   :  { %v176_v35 = vmul.f32 %v153_v25, %v1221_v15  ;;  %v191_v39 = vmul.f32 %v175_v28, %v67_v33  ;;  %v730_v28 = vld [vmem:[#allocation5 + $0xa0] sm:$0xff] }
  0x49   :  { %912 = vmatmul.mubr.f32.vlgmr.msra.gmra.mrb[0].mxu0 %v179_v8  ;;  %968 = vmatmul.mubr.f32.vlgmr.msra.gmra.mrb[0].mxu1 %v542_v9  ;;  %v482_v8 = vcombine.high %v478_v40, %v478_v40  ;;  %v808_v9 = vld [vmem:[%s1487_s1 + $0xd0] sm:$0xff]  ;;  %v192_v43 = vmul.f32 %v176_v35, %v68_v37  ;;  %v370_v35 = vld [vmem:[#allocation5 + $0x38] sm:$0xff] }
  0x4a   :  { %914 = vmatprep.mubr.f32.mxu0 %v180_v14  ;;  %970 = vmatprep.mubr.f32.mxu1 %v543_v16  ;;  %v174_v14 = vmul.f32 %v149_v63, %v1221_v15  ;;  %v188_v16 = vmul.f32 %v172_v3, %v64_v5  ;;  %v551_v21 = vmul.f32 %v808_v9, %v535_v6  ;;  %v365_v6 = vld [vmem:[#allocation5 + $0x10] sm:$0xff]  ;;  %v733_v37 = vld [vmem:[#allocation5 + $0xb8] sm:$0xff] }
  0x4b   :  { %v516_v26 = vrot.slane %v482_v8, %v1231_v19  ;;  %v728_v8 = vld [vmem:[#allocation5 + $0x90] sm:$0xff] }
  0x4c   :  { %v190_v32 = vmul.f32 %v174_v14, %v66_v24 }
  0x4d   :  { %915 = vmatmul.mubr.f32.gmra.mrb[2].mxu0 %v181_v27  ;;  %971 = vmatmul.mubr.f32.gmra.mrb[2].mxu1 %v544_v29  ;;  %v810_v27 = vld [vmem:[%s1487_s1 + $0xe0] sm:$0xff]  ;;  %v538_v29 = vmul.f32 %v512_v4, %v1233_v20  ;;  %v539_v36 = vmul.f32 %v516_v26, %v1221_v15  ;;  %v540_v42 = vmul.f32 %v516_v26, %v1233_v20  ;;  %v367_v26 = vld [vmem:[#allocation5 + $0x20] sm:$0xff] }
  0x4e   :  { %917 = vmatprep.mubr.f32.mxu0 %v182_v30  ;;  %973 = vmatprep.mubr.f32.mxu1 %v545_v34  ;;  %v189_v30 = vmul.f32 %v173_v12, %v65_v22  ;;  %v553_v19 = vmul.f32 %v810_v27, %v537_v18  ;;  %v811_v34 = vld [vmem:[%s1487_s1 + $0xe8] sm:$0xff]  ;;  %v368_v18 = vld [vmem:[#allocation5 + $0x28] sm:$0xff] }
  0x4f   :  { %v554_v40 = vmul.f32 %v811_v34, %v538_v29  ;;  %v555_v15 = vmul.f32 %v812_v38, %v539_v36  ;;  %v731_v22 = vld [vmem:[#allocation5 + $0xa8] sm:$0xff] }
  0x51   :  { %918 = vmatmul.mubr.f32.gmra.mrb[4].mxu0 %v183_v41  ;;  %974 = vmatmul.mubr.f32.gmra.mrb[4].mxu1 %v546_v45  ;;  %v177_v41 = vmul.f32 %v1233_v20, %v153_v25  ;;  %v813_v45 = vld [vmem:[%s1487_s1 + $0xf8] sm:$0xff]  ;;  %v1437_v20 = vld [vmem:[%s1490_s4] ss:$0 sm:$0xff]  ;;  %s1140_s1 = smov [#allocation7]  }
  0x52   :  { %920 = vmatprep.mubr.f32.mxu0 %v184_v54  ;;  %976 = vmatprep.mubr.f32.mxu1 %v547_v55  ;;  %v556_v47 = vmul.f32 %v813_v45, %v540_v42  ;;  %v363_v54 = vld [vmem:[#allocation5] sm:$0xff]  ;;  %s780_s4 = sshll.u32 %s1140_s1, 4  ;;  %s781_s4 = int_to_ptr.vmem [resolvable:$true] %s780_s4 }
  0x53   :  { %v193_v46 = vmul.f32 %v177_v41, %v69_v44  ;;  %v369_v41 = vld [vmem:[#allocation5 + $0x30] sm:$0xff]  ;;  %s1107_s14 = scalar_lea.vmem %s781_s4, 4096  ;;  %p1112_p3 = scmp.lt.s32.totalorder %s781_s4, %s781_s4 }
  0x54   :  { %p1108_p2 = scmp.ne.s32.totalorder %s781_s4, %s1107_s14  ;;  %p1113_p4 = scmp.lt.s32.totalorder %s1107_s14, %s1107_s14 }
  0x55   :  { %921 = vmatmul.mubr.f32.gmra.mrb[6].mxu0 %v185_v58  ;;  %977 = vmatmul.mubr.f32.gmra.mrb[6].mxu1 %v548_v60 }
  0x56   :  { %923 = vmatprep.mubr.f32.mxu0 %v186_v61  ;;  %979 = vmatprep.mubr.f32.mxu1 %v549_v0  ;;  %v366_v0 = vld [vmem:[#allocation5 + $0x18] sm:$0xff]  ;;  %p1114_p5 = por %p1113_p4, %p1112_p3 }
  0x58   :  { %p1115_p6 = pnand %p1114_p5, %p1108_p2 }
  0x59   :  { %924 = vmatmul.mubr.f32.gmra.mrb[8].mxu0 %v187_v10  ;;  %980 = vmatmul.mubr.f32.gmra.mrb[8].mxu1 %v550_v11 }
  0x5a   :  { %926 = vmatprep.mubr.f32.mxu0 %v188_v16  ;;  %982 = vmatprep.mubr.f32.mxu1 %v551_v21 }
  0x5d   :  { %927 = vmatmul.mubr.f32.gmra.mrb[10].mxu0 %v189_v30  ;;  %983 = vmatmul.mubr.f32.gmra.mrb[10].mxu1 %v552_v31 }
  0x5e   :  { %929 = vmatprep.mubr.f32.mxu0 %v190_v32  ;;  %985 = vmatprep.mubr.f32.mxu1 %v553_v19 }
  0x61   :  { %930 = vmatmul.mubr.f32.gmra.mrb[12].mxu0 %v191_v39  ;;  %986 = vmatmul.mubr.f32.gmra.mrb[12].mxu1 %v554_v40 }
  0x62   :  { %932 = vmatprep.mubr.f32.mxu0 %v192_v43  ;;  %988 = vmatprep.mubr.f32.mxu1 %v555_v15  ;;  %v732_v43 = vld [vmem:[#allocation5 + $0xb0] sm:$0xff] }
  0x65   :  { %933 = vmatmul.mubr.f32.gmra.mrb[14].mxu0 %v193_v46  ;;  %989 = vmatmul.mubr.f32.gmra.mrb[14].mxu1 %v556_v47 }
 0x11c   :  { %v913_v13 = vpop.f32.mrb[0].mxu0  ;;  %v969_v49 = vpop.f32.mrb[0].mxu1 }
 0x11d   :  { %v289_v51 = vadd.f32 %v913_v13, %v1437_v20  ;;  %v652_v52 = vadd.f32 %v969_v49, %v1437_v20  ;;  %v283_v53 = vpop.f32.mrb[1].mxu0  ;;  %v646_v55 = vpop.f32.mrb[1].mxu1  ;;  %v372_v49 = vld [vmem:[#allocation5 + $0x48] sm:$0xff] }
 0x11e   :  { %v284_v57 = vadd.f32 %v1437_v20, %v283_v53  ;;  %v647_v58 = vadd.f32 %v1437_v20, %v646_v55  ;;  %v371_v55 = vld [vmem:[#allocation5 + $0x40] sm:$0xff] }
 0x11f   :  { %v380_v59 = vmul.f32 %v364_v48, %v289_v51  ;;  %v743_v60 = vmul.f32 %v727_v50, %v652_v52  ;;  %v735_v51 = vld [vmem:[#allocation5 + $0xc8] sm:$0xff] }
 0x120   :  { %v379_v61 = vmul.f32 %v363_v54, %v284_v57  ;;  %v742_v62 = vmul.f32 %v726_v56, %v647_v58  ;;  %v916_v63 = vpop.f32.mrb[2].mxu0  ;;  %v972_v1 = vpop.f32.mrb[2].mxu1  ;;  %v734_v57 = vld [vmem:[#allocation5 + $0xc0] sm:$0xff] }
 0x121   :  { %397 = vst [vmem:[#allocation7 + $0x8] sm:$0xff] %v380_v59  ;;  %760 = vst [vmem:[#allocation7 + $0x88] sm:$0xff] %v743_v60  ;;  %v299_v3 = vadd.f32 %v916_v63, %v1437_v20  ;;  %v662_v4 = vadd.f32 %v972_v1, %v1437_v20  ;;  %v293_v5 = vpop.f32.mrb[3].mxu0  ;;  %v656_v7 = vpop.f32.mrb[3].mxu1  ;;  %v374_v1 = vld [vmem:[#allocation5 + $0x58] sm:$0xff] }
 0x122   :  { %396 = vst [vmem:[#allocation7] sm:$0xff] %v379_v61  ;;  %759 = vst [vmem:[#allocation7 + $0x80] sm:$0xff] %v742_v62  ;;  %v294_v9 = vadd.f32 %v1437_v20, %v293_v5  ;;  %v657_v10 = vadd.f32 %v1437_v20, %v656_v7  ;;  %v373_v7 = vld [vmem:[#allocation5 + $0x50] sm:$0xff] }
 0x123   :  { %v382_v11 = vmul.f32 %v366_v0, %v299_v3  ;;  %v745_v12 = vmul.f32 %v729_v2, %v662_v4  ;;  %v737_v3 = vld [vmem:[#allocation5 + $0xd8] sm:$0xff] }
 0x124   :  { %v381_v14 = vmul.f32 %v365_v6, %v294_v9  ;;  %v744_v16 = vmul.f32 %v728_v8, %v657_v10  ;;  %v919_v17 = vpop.f32.mrb[4].mxu0  ;;  %v975_v21 = vpop.f32.mrb[4].mxu1  ;;  %v736_v9 = vld [vmem:[#allocation5 + $0xd0] sm:$0xff] }
 0x125   :  { %399 = vst [vmem:[#allocation7 + $0x18] sm:$0xff] %v382_v11  ;;  %762 = vst [vmem:[#allocation7 + $0x98] sm:$0xff] %v745_v12  ;;  %v309_v23 = vadd.f32 %v919_v17, %v1437_v20  ;;  %v672_v24 = vadd.f32 %v975_v21, %v1437_v20  ;;  %v303_v25 = vpop.f32.mrb[5].mxu0  ;;  %v666_v27 = vpop.f32.mrb[5].mxu1  ;;  %v376_v21 = vld [vmem:[#allocation5 + $0x68] sm:$0xff] }
 0x126   :  { %398 = vst [vmem:[#allocation7 + $0x10] sm:$0xff] %v381_v14  ;;  %761 = vst [vmem:[#allocation7 + $0x90] sm:$0xff] %v744_v16  ;;  %v304_v29 = vadd.f32 %v1437_v20, %v303_v25  ;;  %v667_v30 = vadd.f32 %v1437_v20, %v666_v27  ;;  %v375_v27 = vld [vmem:[#allocation5 + $0x60] sm:$0xff] }
 0x127   :  { %v384_v31 = vmul.f32 %v368_v18, %v309_v23  ;;  %v747_v32 = vmul.f32 %v731_v22, %v672_v24  ;;  %v739_v23 = vld [vmem:[#allocation5 + $0xe8] sm:$0xff] }
 0x128   :  { %v383_v33 = vmul.f32 %v367_v26, %v304_v29  ;;  %v746_v19 = vmul.f32 %v730_v28, %v667_v30  ;;  %v922_v34 = vpop.f32.mrb[6].mxu0  ;;  %v978_v36 = vpop.f32.mrb[6].mxu1  ;;  %v738_v29 = vld [vmem:[#allocation5 + $0xe0] sm:$0xff] }
 0x129   :  { %401 = vst [vmem:[#allocation7 + $0x28] sm:$0xff] %v384_v31  ;;  %764 = vst [vmem:[#allocation7 + $0xa8] sm:$0xff] %v747_v32  ;;  %v319_v38 = vadd.f32 %v922_v34, %v1437_v20  ;;  %v682_v39 = vadd.f32 %v978_v36, %v1437_v20  ;;  %v313_v40 = vpop.f32.mrb[7].mxu0  ;;  %v676_v42 = vpop.f32.mrb[7].mxu1  ;;  %v378_v36 = vld [vmem:[#allocation5 + $0x78] sm:$0xff] }
 0x12a   :  { %400 = vst [vmem:[#allocation7 + $0x20] sm:$0xff] %v383_v33  ;;  %763 = vst [vmem:[#allocation7 + $0xa0] sm:$0xff] %v746_v19  ;;  %v314_v15 = vadd.f32 %v1437_v20, %v313_v40  ;;  %v677_v44 = vadd.f32 %v1437_v20, %v676_v42  ;;  %v377_v42 = vld [vmem:[#allocation5 + $0x70] sm:$0xff] }
 0x12b   :  { %v386_v45 = vmul.f32 %v370_v35, %v319_v38  ;;  %v749_v46 = vmul.f32 %v733_v37, %v682_v39  ;;  %v741_v38 = vld [vmem:[#allocation5 + $0xf8] sm:$0xff] }
 0x12c   :  { %v385_v47 = vmul.f32 %v369_v41, %v314_v15  ;;  %v748_v13 = vmul.f32 %v732_v43, %v677_v44  ;;  %v925_v48 = vpop.f32.mrb[8].mxu0  ;;  %v981_v50 = vpop.f32.mrb[8].mxu1  ;;  %v740_v15 = vld [vmem:[#allocation5 + $0xf0] sm:$0xff] }
 0x12d   :  { %403 = vst [vmem:[#allocation7 + $0x38] sm:$0xff] %v386_v45  ;;  %766 = vst [vmem:[#allocation7 + $0xb8] sm:$0xff] %v749_v46  ;;  %v329_v52 = vadd.f32 %v925_v48, %v1437_v20  ;;  %v692_v53 = vadd.f32 %v981_v50, %v1437_v20  ;;  %v323_v54 = vpop.f32.mrb[9].mxu0  ;;  %v686_v56 = vpop.f32.mrb[9].mxu1 }
 0x12e   :  { %402 = vst [vmem:[#allocation7 + $0x30] sm:$0xff] %v385_v47  ;;  %765 = vst [vmem:[#allocation7 + $0xb0] sm:$0xff] %v748_v13  ;;  %v324_v58 = vadd.f32 %v1437_v20, %v323_v54  ;;  %v687_v59 = vadd.f32 %v1437_v20, %v686_v56 }
 0x12f   :  { %v388_v60 = vmul.f32 %v372_v49, %v329_v52  ;;  %v751_v61 = vmul.f32 %v735_v51, %v692_v53 }
 0x130   :  { %v387_v62 = vmul.f32 %v371_v55, %v324_v58  ;;  %v750_v63 = vmul.f32 %v734_v57, %v687_v59  ;;  %v928_v0 = vpop.f32.mrb[10].mxu0  ;;  %v984_v2 = vpop.f32.mrb[10].mxu1 }
 0x131   :  { %405 = vst [vmem:[#allocation7 + $0x48] sm:$0xff] %v388_v60  ;;  %768 = vst [vmem:[#allocation7 + $0xc8] sm:$0xff] %v751_v61  ;;  %v339_v4 = vadd.f32 %v928_v0, %v1437_v20  ;;  %v702_v5 = vadd.f32 %v984_v2, %v1437_v20  ;;  %v333_v6 = vpop.f32.mrb[11].mxu0  ;;  %v696_v8 = vpop.f32.mrb[11].mxu1 }
 0x132   :  { %404 = vst [vmem:[#allocation7 + $0x40] sm:$0xff] %v387_v62  ;;  %767 = vst [vmem:[#allocation7 + $0xc0] sm:$0xff] %v750_v63  ;;  %v334_v10 = vadd.f32 %v1437_v20, %v333_v6  ;;  %v697_v11 = vadd.f32 %v1437_v20, %v696_v8 }
 0x133   :  { %v390_v12 = vmul.f32 %v374_v1, %v339_v4  ;;  %v753_v14 = vmul.f32 %v737_v3, %v702_v5 }
 0x134   :  { %v389_v16 = vmul.f32 %v373_v7, %v334_v10  ;;  %v752_v17 = vmul.f32 %v736_v9, %v697_v11  ;;  %v931_v18 = vpop.f32.mrb[12].mxu0  ;;  %v987_v22 = vpop.f32.mrb[12].mxu1 }
 0x135   :  { %407 = vst [vmem:[#allocation7 + $0x58] sm:$0xff] %v390_v12  ;;  %770 = vst [vmem:[#allocation7 + $0xd8] sm:$0xff] %v753_v14  ;;  %v349_v24 = vadd.f32 %v931_v18, %v1437_v20  ;;  %v712_v25 = vadd.f32 %v987_v22, %v1437_v20  ;;  %v343_v26 = vpop.f32.mrb[13].mxu0  ;;  %v706_v28 = vpop.f32.mrb[13].mxu1 }
 0x136   :  { %406 = vst [vmem:[#allocation7 + $0x50] sm:$0xff] %v389_v16  ;;  %769 = vst [vmem:[#allocation7 + $0xd0] sm:$0xff] %v752_v17  ;;  %v344_v30 = vadd.f32 %v1437_v20, %v343_v26  ;;  %v707_v31 = vadd.f32 %v1437_v20, %v706_v28 }
 0x137   :  { %v392_v32 = vmul.f32 %v376_v21, %v349_v24  ;;  %v755_v33 = vmul.f32 %v739_v23, %v712_v25 }
 0x138   :  { %v391_v19 = vmul.f32 %v375_v27, %v344_v30  ;;  %v754_v34 = vmul.f32 %v738_v29, %v707_v31  ;;  %v934_v35 = vpop.f32.mrb[14].mxu0  ;;  %v990_v37 = vpop.f32.mrb[14].mxu1 }
 0x139   :  { %409 = vst [vmem:[#allocation7 + $0x68] sm:$0xff] %v392_v32  ;;  %772 = vst [vmem:[#allocation7 + $0xe8] sm:$0xff] %v755_v33  ;;  %v359_v39 = vadd.f32 %v934_v35, %v1437_v20  ;;  %v722_v40 = vadd.f32 %v990_v37, %v1437_v20  ;;  %v353_v41 = vpop.f32.mrb[15].mxu0  ;;  %v716_v43 = vpop.f32.mrb[15].mxu1 }
 0x13a   :  { %408 = vst [vmem:[#allocation7 + $0x60] sm:$0xff] %v391_v19  ;;  %771 = vst [vmem:[#allocation7 + $0xe0] sm:$0xff] %v754_v34  ;;  %v354_v44 = vadd.f32 %v1437_v20, %v353_v41  ;;  %v717_v45 = vadd.f32 %v1437_v20, %v716_v43 }
 0x13b   :  { %v394_v46 = vmul.f32 %v378_v36, %v359_v39  ;;  %v757_v47 = vmul.f32 %v741_v38, %v722_v40 }
 0x13c   :  { %v393_v13 = vmul.f32 %v377_v42, %v354_v44  ;;  %v756_v48 = vmul.f32 %v740_v15, %v717_v45 }
 0x13d   :  { %411 = vst [vmem:[#allocation7 + $0x78] sm:$0xff] %v394_v46  ;;  %774 = vst [vmem:[#allocation7 + $0xf8] sm:$0xff] %v757_v47 }
 0x13e   :  { %410 = vst [vmem:[#allocation7 + $0x70] sm:$0xff] %v393_v13  ;;  %773 = vst [vmem:[#allocation7 + $0xf0] sm:$0xff] %v756_v48 }
 0x13f   :  { %1118 = shalt.err (!%p1115_p6)
}
 0x140   :  { %s1119_s0 = scalar_lea.hbm %s1491_s5, 4096 }
 0x141   :  { %p1120_p7 = scmp.ne.s32.totalorder %s1491_s5, %s1119_s0  ;;  %p1123_p8 = scmp.lt.u32.totalorder %s1119_s0, %s1491_s5 }
 0x143   :  { %p1125_p9 = pnand %p1123_p8, %p1120_p7 }
 0x145   :  { %1128 = shalt.err (!%p1125_p9)
}
 0x146   :  { %786 = dma.vmem_to_hbm [thread:$0]  %s781_s4, 4096, %s1491_s5, [#allocation4], %s1136_s28, %s1136_s28, %s1137_s29  }
 0x147   :  { %1133 = dma.done.wait [#allocation4], 4096  }
 0x148   :  { %1134 = vsyncadd [#allocation4], 4294963200 }
 0x149   :  { %790 = vsyncpa [#allocation3], 1 }
 0x14a   :  { %791 = vsyncpa [#allocation6], 1 }
 0x14b   :  { %792 = vsyncpa [#allocation4], 1 }

</bundles_post_ra>
